<compile_context>
chip_gen: v5e
topology: v5e:2x2
jax: 0.10.0
libtpu: 0.0.40
codegen_flags: <defaults>
</compile_context>

<pallas_src>
import functools

import numpy as np
import jax
import jax.numpy as jnp
from jax.experimental import pallas as pl
from jax.experimental.pallas import tpu as pltpu


# --------------------------------------------------------------------------
# Shared in-kernel helpers
# --------------------------------------------------------------------------
def _round_up(x, m):
    return (x + m - 1) // m * m


def _fwd_window_max(x, k, axis):
    """Forward running max: out[i] = max(x[i], ..., x[i+k-1]).

    Log-doubling composition (f_{a+b}[i] = max(f_a[i], f_b[i+a])) using
    circular pltpu.roll shifts.  Callers pad the array with >= (k-1) extra
    -inf elements along `axis` so that every needed output position only
    reads non-wrapped data.
    """
    size = x.shape[axis]

    def shift_left(a, s):
        if s == 0:
            return a
        return pltpu.roll(a, shift=(-s) % size, axis=axis)

    result = None
    offset = 0
    f = x          # running forward max of length `length` (a power of two)
    length = 1
    kk = k
    while kk > 0:
        if kk & 1:
            piece = shift_left(f, offset)
            result = piece if result is None else jnp.maximum(result, piece)
            offset += length
        kk >>= 1
        if kk:
            f = jnp.maximum(f, shift_left(f, length))
            length *= 2
    return result


def _nms_compute(x, *, ksize, rep_thr):
    """maxima = (x == maxpool_{k,stride=1,pad=k//2}(x)) & (x >= rep_thr).

    x: (H, W) f32 -> (H, W) bool.  Separable max filter on a -inf padded tile
    whose padded shape is lane/sublane aligned (mult of 8 x mult of 128), so
    each pltpu.roll is a clean XLU op.  ~5 rolls per axis for k=17.
    """
    H, W = x.shape
    r = ksize // 2
    if r > 0:
        HP = _round_up(H + 2 * r, 8)
        WP = _round_up(W + 2 * r, 128)
        ninf = jnp.float32(-jnp.inf)
        top = jnp.full((r, W), ninf, jnp.float32)
        bot = jnp.full((HP - H - r, W), ninf, jnp.float32)
        xp = jnp.concatenate([top, x, bot], axis=0)              # (HP, W)
        left = jnp.full((HP, r), ninf, jnp.float32)
        right = jnp.full((HP, WP - W - r), ninf, jnp.float32)
        xp = jnp.concatenate([left, xp, right], axis=1)          # (HP, WP)
    else:
        xp = x
    xp = _fwd_window_max(xp, ksize, axis=1)   # columns (lane axis)
    xp = _fwd_window_max(xp, ksize, axis=0)   # rows    (sublane axis)
    pooled = xp[0:H, 0:W]
    return (x == pooled) & (x >= jnp.float32(rep_thr))


# --------------------------------------------------------------------------
# Pallas kernels
# --------------------------------------------------------------------------
def _warp_nms_kernel(s2_ref, af_ref, warp_ref, max_ref, *,
                     ksize, rep_thr, use_bf16_matmul):
    """Fused, row-tiled: sali2to1 = grid_sample(sali2, grid(aflow)) and its NMS.

    Grid = (batch, row-tile).  Per step:
      s2_ref  : (H, W)    — full source saliency (constant over the tile axis)
      af_ref  : (2, TQ, W)— aflow rows for this tile (ch 0 = x, ch 1 = y)
      warp_ref: (H, W) f32— full warped output block (resident across tiles)
      max_ref : (H, W) i8 — NMS mask (written on the last tile only)
    """
    H, W = warp_ref.shape
    TQ = af_ref.shape[1]
    qt = pl.program_id(1)
    n_qt = pl.num_programs(1)
    row0 = pl.multiple_of(qt * TQ, TQ)

    s_src = s2_ref[...].astype(jnp.float32)                    # (H, W)
    a = af_ref[...].astype(jnp.float32)                        # (2, TQ, W)
    ax = a[0]                                                  # (TQ, W)
    ay = a[1]                                                  # (TQ, W)

    # _aflow_to_grid + grid_sample un-normalization (align_corners=False),
    # folded into one affine per axis; NaN -> huge -> zero weights.
    big = jnp.float32(9e9)
    ix = jnp.where(jnp.isnan(ax), big, ax * jnp.float32(W / (W - 1.0)) - 0.5)
    iy = jnp.where(jnp.isnan(ay), big, ay * jnp.float32(H / (H - 1.0)) - 0.5)

    # ---- stage 1: y interpolation as a (TQ*W, H) x (H, W) MXU matmul -------
    # Hat weights ry[q,w,j] = max(0, 1 - |j - iy|): equals the bilinear corner
    # weight for j in {floor(iy), floor(iy)+1}, zero elsewhere and for
    # out-of-range corners (zeros padding) / NaN flow.
    jy = jax.lax.broadcasted_iota(jnp.int32, (TQ, W, H), 2).astype(jnp.float32)
    ry = jnp.maximum(0.0, 1.0 - jnp.abs(jy - iy[:, :, None]))   # (TQ, W, Hs)
    ry2 = ry.reshape(TQ * W, H)
    if use_bf16_matmul:
        t = jnp.dot(ry2.astype(jnp.bfloat16), s_src.astype(jnp.bfloat16),
                    preferred_element_type=jnp.float32)
    else:
        t = jnp.dot(ry2, s_src, preferred_element_type=jnp.float32)
    t = t.reshape(TQ, W, W)                                     # (TQ, W, Ws)

    # ---- stage 2: x interpolation as hat-weight multiply + lane reduce ------
    jx = jax.lax.broadcasted_iota(jnp.int32, (TQ, W, W), 2).astype(jnp.float32)
    cx = jnp.maximum(0.0, 1.0 - jnp.abs(jx - ix[:, :, None]))   # (TQ, W, Ws)
    warped = jnp.sum(cx * t, axis=2)                            # (TQ, W)

    warp_ref[pl.ds(row0, TQ), :] = warped.astype(warp_ref.dtype)

    # ---- fused NMS on the fully assembled warped saliency -------------------
    @pl.when(qt == n_qt - 1)
    def _():
        full = warp_ref[...]                                    # (H, W) f32
        max_ref[...] = _nms_compute(full, ksize=ksize,
                                    rep_thr=rep_thr).astype(max_ref.dtype)


def _nms_kernel(sal_ref, max_ref, *, ksize, rep_thr):
    x = sal_ref[...].astype(jnp.float32)                        # (H, W)
    max_ref[...] = _nms_compute(x, ksize=ksize,
                                rep_thr=rep_thr).astype(max_ref.dtype)


# --------------------------------------------------------------------------
# Wrappers
# --------------------------------------------------------------------------
def _pick_tile_rows(H, W, budget_bytes=12 * 1024 * 1024):
    """Largest row-tile TQ (multiple of 8, dividing H) whose ~4 live f32
    (TQ, W, H+W)-ish intermediates fit the VMEM budget."""
    per_row = 4 * W * (H + W) * 4
    tq = budget_bytes // max(per_row, 1)
    tq = min(H, max(8, (tq // 8) * 8))
    while tq > 8 and H % tq != 0:
        tq -= 8
    if H % tq != 0:
        tq = H        # fallback: single tile (H not a multiple of 8)
    return tq


def warp_and_nms(sali2, aflow, ksize=17, rep_thr=0.0, tile_rows=None,
                 use_bf16_matmul=False):
    """Returns (sali2to1 f32 (B,1,H,W), maxima2 int8 (B,1,H,W))."""
    B, C, H, W = sali2.shape
    assert C == 1 and aflow.shape == (B, 2, H, W)
    assert ksize % 2 == 1
    TQ = tile_rows if tile_rows is not None else _pick_tile_rows(H, W)
    assert H % TQ == 0, f"tile_rows={TQ} must divide H={H}"
    n_qt = H // TQ

    kernel = functools.partial(_warp_nms_kernel, ksize=ksize,
                               rep_thr=float(rep_thr),
                               use_bf16_matmul=use_bf16_matmul)
    warped, maxima = pl.pallas_call(
        kernel,
        out_shape=(jax.ShapeDtypeStruct((B, 1, H, W), jnp.float32),
                   jax.ShapeDtypeStruct((B, 1, H, W), jnp.int8)),
        grid=(B, n_qt),
        in_specs=[pl.BlockSpec((None, None, H, W), lambda b, q: (b, 0, 0, 0)),
                  pl.BlockSpec((None, 2, TQ, W), lambda b, q: (b, 0, q, 0))],
        out_specs=(pl.BlockSpec((None, None, H, W), lambda b, q: (b, 0, 0, 0)),
                   pl.BlockSpec((None, None, H, W), lambda b, q: (b, 0, 0, 0))),
        compiler_params=pltpu.CompilerParams(
            dimension_semantics=("parallel", "arbitrary"),
            vmem_limit_bytes=32 * 1024 * 1024),
    )(sali2, aflow)                       # native dtypes; cast happens in VMEM
    return warped, maxima


def max_filter_nms(sal, ksize=17, rep_thr=0.0):
    """NMS maxima mask (int8) — (B,1,H,W) -> (B,1,H,W)."""
    B, C, H, W = sal.shape
    assert C == 1 and ksize % 2 == 1
    kernel = functools.partial(_nms_kernel, ksize=ksize, rep_thr=float(rep_thr))
    return pl.pallas_call(
        kernel,
        out_shape=jax.ShapeDtypeStruct((B, 1, H, W), jnp.int8),
        grid=(B,),
        in_specs=[pl.BlockSpec((None, None, H, W), lambda b: (b, 0, 0, 0))],
        out_specs=pl.BlockSpec((None, None, H, W), lambda b: (b, 0, 0, 0)),
        compiler_params=pltpu.CompilerParams(
            dimension_semantics=("parallel",),
            vmem_limit_bytes=32 * 1024 * 1024),
    )(sal)


def reprojection_loc_loss_forward(repeatability, aflow, ksize=17, rep_thr=0.0):
    """Mirrors ReprojectionLocLoss.forward (which returns the constant 1)."""
    sali1, sali2 = repeatability
    B, two, H, W = aflow.shape
    assert two == 2

    sali2to1, maxima2 = warp_and_nms(sali2, aflow, ksize, rep_thr)   # fused Pallas kernel
    maxima1 = max_filter_nms(sali1, ksize, rep_thr)                  # Pallas kernel

    # torch.nonzero has a data-dependent output shape -> host side (numpy).
    locs1 = np.stack(np.nonzero(np.asarray(maxima1)), axis=1)        # (K1, 4)
    locs2 = np.stack(np.nonzero(np.asarray(maxima2)), axis=1)        # (K2, 4)
    diff = locs1[None, :, :].astype(np.int64) - locs2[:, None, :].astype(np.int64)
    dists = np.sum(diff ** 2, axis=-1)
    mask = diff[:, :, 0] == 0
    _ = dists * mask
    # TODO(synk): plt.imshow(dists * mask); plt.show() — visualization only, no kernel equivalent.
    return 1


# --------------------------------------------------------------------------
# Pure-JAX references (validation only)
# --------------------------------------------------------------------------
def _warp_reference(sali2, aflow):
    B, _, H, W = aflow.shape
    gx = aflow[:, 0] * (2.0 / (W - 1)) - 1.0
    gy = aflow[:, 1] * (2.0 / (H - 1)) - 1.0
    gx = jnp.where(jnp.isnan(gx), 9e9, gx)
    gy = jnp.where(jnp.isnan(gy), 9e9, gy)
    ix = ((gx + 1.0) * W - 1.0) * 0.5
    iy = ((gy + 1.0) * H - 1.0) * 0.5
    x0 = jnp.floor(ix)
    y0 = jnp.floor(iy)
    s = sali2[:, 0].reshape(B, H * W)
    out = jnp.zeros((B, H, W), jnp.float32)
    for dy in (0, 1):
        for dx in (0, 1):
            xc = x0 + dx
            yc = y0 + dy
            wx = (1.0 - (ix - x0)) if dx == 0 else (ix - x0)
            wy = (1.0 - (iy - y0)) if dy == 0 else (iy - y0)
            valid = (xc >= 0) & (xc <= W - 1) & (yc >= 0) & (yc <= H - 1)
            w = jnp.where(valid, wx * wy, 0.0)
            xi = jnp.clip(xc, 0, W - 1).astype(jnp.int32)
            yi = jnp.clip(yc, 0, H - 1).astype(jnp.int32)
            flat = (yi * W + xi).reshape(B, H * W)
            g = jnp.take_along_axis(s, flat, axis=1).reshape(B, H, W)
            out = out + w * g
    return out[:, None]


def _maxpool_reference(sal, ksize):
    pad = ksize // 2
    return jax.lax.reduce_window(
        sal, -jnp.inf, jax.lax.max,
        (1, 1, ksize, ksize), (1, 1, 1, 1),
        [(0, 0), (0, 0), (pad, pad), (pad, pad)])


# --------------------------------------------------------------------------
if __name__ == "__main__":
    key = jax.random.PRNGKey(0)
    k1, k2, k3 = jax.random.split(key, 3)
    B, H, W = 2, 16, 16

    sali1 = jax.random.uniform(k1, (B, 1, H, W), jnp.float32)
    sali2 = jax.random.uniform(k2, (B, 1, H, W), jnp.float32)

    # absolute flow: pixel coordinates in image 2 for each pixel of image 1
    yy, xx = jnp.meshgrid(jnp.arange(H, dtype=jnp.float32),
                          jnp.arange(W, dtype=jnp.float32), indexing="ij")
    base = jnp.stack([xx, yy], axis=0)[None]                       # (1, 2, H, W)
    noise = 2.0 * jax.random.normal(k3, (B, 2, H, W), jnp.float32)
    aflow = base + noise
    aflow = aflow.at[0, :, 0, 0].set(jnp.nan)                      # exercise NaN path

    # run Pallas kernels (tile_rows=8 -> two row-tiles, exercising the tiled
    # accumulator + fused-NMS-on-last-tile path) and block
    sali2to1, maxima2 = warp_and_nms(sali2, aflow, tile_rows=8)
    sali2to1 = jax.block_until_ready(sali2to1)
    maxima2 = jax.block_until_ready(maxima2)
    maxima1 = jax.block_until_ready(max_filter_nms(sali1))

    # validate against pure-JAX references
    ref_warp = _warp_reference(sali2, aflow)
    np.testing.assert_allclose(np.asarray(sali2to1), np.asarray(ref_warp),
                               rtol=1e-5, atol=1e-5)
    ref_pool1 = _maxpool_reference(sali1, 17)
    ref_max1 = ((sali1 == ref_pool1) & (sali1 >= 0.0)).astype(jnp.int8)
    np.testing.assert_array_equal(np.asarray(maxima1), np.asarray(ref_max1))
    ref_pool2 = _maxpool_reference(sali2to1, 17)
    ref_max2 = ((sali2to1 == ref_pool2) & (sali2to1 >= 0.0)).astype(jnp.int8)
    np.testing.assert_array_equal(np.asarray(maxima2), np.asarray(ref_max2))

    # full forward (default auto tile_rows; returns the constant 1, like the PyTorch module)
    result = reprojection_loc_loss_forward((sali1, sali2), aflow)
    assert result == 1

    print("KERNEL_OK")
</pallas_src>

<mosaic_0001>
module attributes {stable_mosaic.version = 11 : i64} {
  func.func @_warp_nms_kernel(%arg0: i32, %arg1: i32, %arg2: memref<1x1x16x16xf32, #tpu.memory_space<vmem>>, %arg3: memref<1x2x8x16xf32, #tpu.memory_space<vmem>>, %arg4: memref<1x1x16x16xf32, #tpu.memory_space<vmem>>, %arg5: memref<1x1x16x16xi8, #tpu.memory_space<vmem>>) attributes {dimension_semantics = [#tpu.dimension_semantics<parallel>, #tpu.dimension_semantics<arbitrary>], iteration_bounds = array<i64: 2, 2>, scalar_prefetch = 0 : i64, scratch_operands = 0 : i64, tpu.core_type = #tpu.core_type<tc>, window_params = [{transform_indices = @transform_0, window_bounds = array<i64: 1, 1, 16, 16>}, {transform_indices = @transform_1, window_bounds = array<i64: 1, 2, 8, 16>}, {transform_indices = @transform_2, window_bounds = array<i64: 1, 1, 16, 16>}, {transform_indices = @transform_3, window_bounds = array<i64: 1, 1, 16, 16>}]} {
    %c8_i32 = arith.constant 8 : i32
    %0 = arith.muli %arg1, %c8_i32 : i32
    %1 = tpu.assume_multiple %0, 8 : i32
    %c0 = arith.constant 0 : index
    %c0_0 = arith.constant 0 : index
    %c0_1 = arith.constant 0 : index
    %c0_2 = arith.constant 0 : index
    %2 = vector.load %arg2[%c0, %c0_0, %c0_1, %c0_2] : memref<1x1x16x16xf32, #tpu.memory_space<vmem>>, vector<1x1x16x16xf32>
    %3 = vector.shape_cast %2 : vector<1x1x16x16xf32> to vector<16x16xf32>
    %c0_3 = arith.constant 0 : index
    %c0_4 = arith.constant 0 : index
    %c0_5 = arith.constant 0 : index
    %c0_6 = arith.constant 0 : index
    %4 = vector.load %arg3[%c0_3, %c0_4, %c0_5, %c0_6] : memref<1x2x8x16xf32, #tpu.memory_space<vmem>>, vector<1x2x8x16xf32>
    %5 = vector.shape_cast %4 : vector<1x2x8x16xf32> to vector<2x8x16xf32>
    %6 = vector.extract_strided_slice %5 {offsets = [0, 0, 0], sizes = [1, 8, 16], strides = [1, 1, 1]} : vector<2x8x16xf32> to vector<1x8x16xf32>
    %7 = vector.shape_cast %6 : vector<1x8x16xf32> to vector<8x16xf32>
    %8 = vector.extract_strided_slice %5 {offsets = [1, 0, 0], sizes = [1, 8, 16], strides = [1, 1, 1]} : vector<2x8x16xf32> to vector<1x8x16xf32>
    %9 = vector.shape_cast %8 : vector<1x8x16xf32> to vector<8x16xf32>
    %10 = arith.cmpf one, %7, %7 : vector<8x16xf32>
    %cst = arith.constant 1.06666672 : f32
    %11 = vector.broadcast %cst : f32 to vector<8x16xf32>
    %12 = arith.mulf %7, %11 : vector<8x16xf32>
    %cst_7 = arith.constant 5.000000e-01 : f32
    %13 = vector.broadcast %cst_7 : f32 to vector<8x16xf32>
    %14 = arith.subf %12, %13 : vector<8x16xf32>
    %cst_8 = arith.constant 8.99999948E+9 : f32
    %15 = vector.broadcast %cst_8 : f32 to vector<8x16xf32>
    %16 = arith.select %10, %15, %14 : vector<8x16xi1>, vector<8x16xf32>
    %17 = arith.cmpf one, %9, %9 : vector<8x16xf32>
    %cst_9 = arith.constant 1.06666672 : f32
    %18 = vector.broadcast %cst_9 : f32 to vector<8x16xf32>
    %19 = arith.mulf %9, %18 : vector<8x16xf32>
    %cst_10 = arith.constant 5.000000e-01 : f32
    %20 = vector.broadcast %cst_10 : f32 to vector<8x16xf32>
    %21 = arith.subf %19, %20 : vector<8x16xf32>
    %cst_11 = arith.constant 8.99999948E+9 : f32
    %22 = vector.broadcast %cst_11 : f32 to vector<8x16xf32>
    %23 = arith.select %17, %22, %21 : vector<8x16xi1>, vector<8x16xf32>
    %24 = tpu.iota {dimensions = array<i32: 2>} : vector<8x16x16xi32>
    %25 = arith.sitofp %24 : vector<8x16x16xi32> to vector<8x16x16xf32>
    %26 = vector.shape_cast %23 : vector<8x16xf32> to vector<8x16x1xf32>
    %27 = vector.broadcast %26 : vector<8x16x1xf32> to vector<8x16x16xf32>
    %28 = arith.subf %25, %27 : vector<8x16x16xf32>
    %29 = math.absf %28 : vector<8x16x16xf32>
    %cst_12 = arith.constant 1.000000e+00 : f32
    %30 = vector.broadcast %cst_12 : f32 to vector<8x16x16xf32>
    %31 = arith.subf %30, %29 : vector<8x16x16xf32>
    %cst_13 = arith.constant 0.000000e+00 : f32
    %32 = vector.broadcast %cst_13 : f32 to vector<8x16x16xf32>
    %33 = arith.maximumf %32, %31 : vector<8x16x16xf32>
    %34 = vector.shape_cast %33 : vector<8x16x16xf32> to vector<128x16xf32>
    %cst_14 = arith.constant dense<0.000000e+00> : vector<128x16xf32>
    %35 = tpu.matmul %34, %3, %cst_14 {dimension_numbers = #tpu.dot_dimension_numbers<[1], [0], [0], [1], [0, 0, 1, 1], [], []>} : vector<128x16xf32>, vector<16x16xf32>, vector<128x16xf32> -> vector<128x16xf32>
    %36 = vector.shape_cast %35 : vector<128x16xf32> to vector<8x16x16xf32>
    %37 = tpu.iota {dimensions = array<i32: 2>} : vector<8x16x16xi32>
    %38 = arith.sitofp %37 : vector<8x16x16xi32> to vector<8x16x16xf32>
    %39 = vector.shape_cast %16 : vector<8x16xf32> to vector<8x16x1xf32>
    %40 = vector.broadcast %39 : vector<8x16x1xf32> to vector<8x16x16xf32>
    %41 = arith.subf %38, %40 : vector<8x16x16xf32>
    %42 = math.absf %41 : vector<8x16x16xf32>
    %cst_15 = arith.constant 1.000000e+00 : f32
    %43 = vector.broadcast %cst_15 : f32 to vector<8x16x16xf32>
    %44 = arith.subf %43, %42 : vector<8x16x16xf32>
    %cst_16 = arith.constant 0.000000e+00 : f32
    %45 = vector.broadcast %cst_16 : f32 to vector<8x16x16xf32>
    %46 = arith.maximumf %45, %44 : vector<8x16x16xf32>
    %47 = arith.mulf %46, %36 : vector<8x16x16xf32>
    %cst_17 = arith.constant dense<0.000000e+00> : vector<8x16xf32>
    %48 = vector.multi_reduction <add>, %47, %cst_17 [2] : vector<8x16x16xf32> to vector<8x16xf32>
    %c0_18 = arith.constant 0 : index
    %c0_19 = arith.constant 0 : index
    %49 = arith.index_cast %1 : i32 to index
    %c0_20 = arith.constant 0 : index
    %50 = vector.load %arg4[%c0_18, %c0_19, %49, %c0_20] : memref<1x1x16x16xf32, #tpu.memory_space<vmem>>, vector<1x1x8x16xf32>
    %51 = vector.shape_cast %50 : vector<1x1x8x16xf32> to vector<8x16xf32>
    %52 = vector.shape_cast %48 : vector<8x16xf32> to vector<1x1x8x16xf32>
    tpu.vector_store %arg4[%c0_18, %c0_19, %49, %c0_20], %52 {strides = array<i32>} : memref<1x1x16x16xf32, #tpu.memory_space<vmem>>, vector<1x1x8x16xf32>,
    %c1_i32 = arith.constant 1 : i32
    %53 = arith.cmpi eq, %arg1, %c1_i32 : i32
    %54 = arith.extui %53 : i1 to i32
    %c0_i32 = arith.constant 0 : i32
    %55 = arith.cmpi ne, %54, %c0_i32 : i32
    scf.if %55 {
      %c0_21 = arith.constant 0 : index
      %c0_22 = arith.constant 0 : index
      %c0_23 = arith.constant 0 : index
      %c0_24 = arith.constant 0 : index
      %56 = vector.load %arg4[%c0_21, %c0_22, %c0_23, %c0_24] : memref<1x1x16x16xf32, #tpu.memory_space<vmem>>, vector<1x1x16x16xf32>
      %57 = vector.shape_cast %56 : vector<1x1x16x16xf32> to vector<16x16xf32>
      %cst_25 = arith.constant 0xFF800000 : f32
      %58 = vector.broadcast %cst_25 : f32 to vector<8x16xf32>
      %cst_26 = arith.constant 0xFF800000 : f32
      %59 = vector.broadcast %cst_26 : f32 to vector<8x16xf32>
      %60 = tpu.concatenate %58, %57, %59 in 0 : vector<8x16xf32>, vector<16x16xf32>, vector<8x16xf32> -> vector<32x16xf32>
      %cst_27 = arith.constant 0xFF800000 : f32
      %61 = vector.broadcast %cst_27 : f32 to vector<32x8xf32>
      %cst_28 = arith.constant 0xFF800000 : f32
      %62 = vector.broadcast %cst_28 : f32 to vector<32x104xf32>
      %63 = tpu.concatenate %61, %60, %62 in 1 : vector<32x8xf32>, vector<32x16xf32>, vector<32x104xf32> -> vector<32x128xf32>
      %c127_i32 = arith.constant 127 : i32
      %64 = tpu.dynamic_rotate %63 by %c127_i32 dim 1 : vector<32x128xf32>, i32 -> vector<32x128xf32>
      %65 = arith.maximumf %63, %64 : vector<32x128xf32>
      %c126_i32 = arith.constant 126 : i32
      %66 = tpu.dynamic_rotate %65 by %c126_i32 dim 1 : vector<32x128xf32>, i32 -> vector<32x128xf32>
      %67 = arith.maximumf %65, %66 : vector<32x128xf32>
      %c124_i32 = arith.constant 124 : i32
      %68 = tpu.dynamic_rotate %67 by %c124_i32 dim 1 : vector<32x128xf32>, i32 -> vector<32x128xf32>
      %69 = arith.maximumf %67, %68 : vector<32x128xf32>
      %c120_i32 = arith.constant 120 : i32
      %70 = tpu.dynamic_rotate %69 by %c120_i32 dim 1 : vector<32x128xf32>, i32 -> vector<32x128xf32>
      %71 = arith.maximumf %69, %70 : vector<32x128xf32>
      %c127_i32_29 = arith.constant 127 : i32
      %72 = tpu.dynamic_rotate %71 by %c127_i32_29 dim 1 : vector<32x128xf32>, i32 -> vector<32x128xf32>
      %73 = arith.maximumf %63, %72 : vector<32x128xf32>
      %c31_i32 = arith.constant 31 : i32
      %74 = tpu.dynamic_rotate %73 by %c31_i32 dim 0 : vector<32x128xf32>, i32 -> vector<32x128xf32>
      %75 = arith.maximumf %73, %74 : vector<32x128xf32>
      %c30_i32 = arith.constant 30 : i32
      %76 = tpu.dynamic_rotate %75 by %c30_i32 dim 0 : vector<32x128xf32>, i32 -> vector<32x128xf32>
      %77 = arith.maximumf %75, %76 : vector<32x128xf32>
      %c28_i32 = arith.constant 28 : i32
      %78 = tpu.dynamic_rotate %77 by %c28_i32 dim 0 : vector<32x128xf32>, i32 -> vector<32x128xf32>
      %79 = arith.maximumf %77, %78 : vector<32x128xf32>
      %c24_i32 = arith.constant 24 : i32
      %80 = tpu.dynamic_rotate %79 by %c24_i32 dim 0 : vector<32x128xf32>, i32 -> vector<32x128xf32>
      %81 = arith.maximumf %79, %80 : vector<32x128xf32>
      %c31_i32_30 = arith.constant 31 : i32
      %82 = tpu.dynamic_rotate %81 by %c31_i32_30 dim 0 : vector<32x128xf32>, i32 -> vector<32x128xf32>
      %83 = arith.maximumf %73, %82 : vector<32x128xf32>
      %84 = vector.extract_strided_slice %83 {offsets = [0, 0], sizes = [16, 16], strides = [1, 1]} : vector<32x128xf32> to vector<16x16xf32>
      %85 = arith.cmpf oeq, %57, %84 : vector<16x16xf32>
      %cst_31 = arith.constant 0.000000e+00 : f32
      %86 = vector.broadcast %cst_31 : f32 to vector<16x16xf32>
      %87 = arith.cmpf oge, %57, %86 : vector<16x16xf32>
      %88 = arith.andi %85, %87 : vector<16x16xi1>
      %89 = arith.extui %88 : vector<16x16xi1> to vector<16x16xi8>
      %c0_32 = arith.constant 0 : index
      %c0_33 = arith.constant 0 : index
      %c0_34 = arith.constant 0 : index
      %c0_35 = arith.constant 0 : index
      %90 = vector.load %arg5[%c0_32, %c0_33, %c0_34, %c0_35] : memref<1x1x16x16xi8, #tpu.memory_space<vmem>>, vector<1x1x16x16xi8>
      %91 = vector.shape_cast %90 : vector<1x1x16x16xi8> to vector<16x16xi8>
      %92 = vector.shape_cast %89 : vector<16x16xi8> to vector<1x1x16x16xi8>
      tpu.vector_store %arg5[%c0_32, %c0_33, %c0_34, %c0_35], %92 {strides = array<i32>} : memref<1x1x16x16xi8, #tpu.memory_space<vmem>>, vector<1x1x16x16xi8>,
    } else {
    }
    return
  }
  func.func @transform_0(%arg0: i32, %arg1: i32) -> (i32, i32, i32, i32) {
    %c0_i32 = arith.constant 0 : i32
    %c0_i32_0 = arith.constant 0 : i32
    %c0_i32_1 = arith.constant 0 : i32
    %c0_i32_2 = arith.constant 0 : i32
    return %arg0, %c0_i32, %c0_i32_0, %c0_i32_1 : i32, i32, i32, i32
  }
  func.func @transform_1(%arg0: i32, %arg1: i32) -> (i32, i32, i32, i32) {
    %c0_i32 = arith.constant 0 : i32
    %c0_i32_0 = arith.constant 0 : i32
    %c0_i32_1 = arith.constant 0 : i32
    return %arg0, %c0_i32, %arg1, %c0_i32_0 : i32, i32, i32, i32
  }
  func.func @transform_2(%arg0: i32, %arg1: i32) -> (i32, i32, i32, i32) {
    %c0_i32 = arith.constant 0 : i32
    %c0_i32_0 = arith.constant 0 : i32
    %c0_i32_1 = arith.constant 0 : i32
    %c0_i32_2 = arith.constant 0 : i32
    return %arg0, %c0_i32, %c0_i32_0, %c0_i32_1 : i32, i32, i32, i32
  }
  func.func @transform_3(%arg0: i32, %arg1: i32) -> (i32, i32, i32, i32) {
    %c0_i32 = arith.constant 0 : i32
    %c0_i32_0 = arith.constant 0 : i32
    %c0_i32_1 = arith.constant 0 : i32
    %c0_i32_2 = arith.constant 0 : i32
    return %arg0, %c0_i32, %c0_i32_0, %c0_i32_1 : i32, i32, i32, i32
  }
}

</mosaic_0001>

<bundles_post_ra>
// kernel: tpu_custom_call.1
= control target key start
LH: loop header
LB: loop body
LE: loop exit
PB: predicated region body
PF: predicated region fallthrough
CT: control target
= control target key end

     0   :  { %s2053_s0 = inlined_call_operand.hbm [shape: f32[2,1,16,16], index: 0, kind: input, shape index: {}]   ;;  %s2054_s1 = inlined_call_operand.hbm [shape: f32[2,2,16,16], index: 1, kind: input, shape index: {}]   ;;  %s2055_s2 = inlined_call_operand.hbm [shape: f32[2,1,16,16], index: 2, kind: output, shape index: {0}]   ;;  %s2056_s3 = inlined_call_operand.hbm [shape: s8[2,1,16,16], index: 3, kind: output, shape index: {1}]  }
   0x1   :  { %2069 = sst [smem:[#allocation20_spill]] %s2053_s0 }
   0x2   :  { %2070 = sst [smem:[#allocation21_spill]] %s2054_s1 }
   0x3   :  { %2071 = sst [smem:[#allocation22_spill]] %s2055_s2 }
   0x4   :  { %2072 = sst [smem:[#allocation23_spill]] %s2056_s3 }
   0x5   :  { %9 = vsyncpa [#allocation3], 0 }
   0x6   :  { %11 = vsyncpa [#allocation3 + $0x1], 0 }
   0x7   :  { %12 = vsyncpa [#allocation6], 0 }
   0x8   :  { %14 = vsyncpa [#allocation6 + $0x1], 0 }
   0x9   :  { %15 = vsyncpa [#allocation4], 0 }
   0xa   :  { %17 = vsyncpa [#allocation4 + $0x1], 0 }
   0xb   :  { %18 = vsyncpa [#allocation9], 0 }
   0xc   :  { %20 = vsyncpa [#allocation9 + $0x1], 0  ;;  %s1623_s12 = smov 0   ;;  %s1625_s13 = smov 0  }
   0xd   :  { %s1627_s14 = smov 0   ;;  %s1629_s15 = smov 0  }
   0xe   :  { %s1631_s16 = smov 0   ;;  %s1633_s17 = smov 0  }
   0xf   :  { %s1635_s18 = smov 0   ;;  %s1637_s19 = smov 0  }
  0x10   :  { %s1639_s20 = smov 0   ;;  %s1641_s21 = smov 0  }
  0x11   :  { %s1643_s22 = smov 0  }
  0x12 LB: > { %2073 = sst [smem:[#allocation14_spill]] %s1559_s15  ;;  %s1173_s23 = sadd.s32 4294967295, %s1587_s22   ;;  %s1587_s22 = sphi %s1643_s22, %s26_s22   ;;  %s1583_s21 = sphi %s1641_s21, %s2110_s21   ;;  %s1579_s20 = sphi %s1639_s20, %s2109_s20   ;;  %s1575_s19 = sphi %s1637_s19, %s2108_s19   ;;  %s1571_s18 = sphi %s1635_s18, %s2107_s18   ;;  %s1567_s17 = sphi %s1633_s17, %s2106_s17   ;;  %s1563_s16 = sphi %s1631_s16, %s2105_s16   ;;  %s1559_s15 = sphi %s1629_s15, %s2104_s15   ;;  %s1555_s14 = sphi %s1627_s14, %s2103_s14   ;;  %s1551_s13 = sphi %s1625_s13, %s2102_s13   ;;  %s1547_s12 = sphi %s1623_s12, %s2101_s12  }
  0x13   : > { %2074 = sst [smem:[#allocation15_spill]] %s1571_s18  ;;  %s1174_s24 = sadd.s32 4294967294, %s1587_s22  }
  0x14   : > { %2075 = sst [smem:[#allocation16_spill]] %s1575_s19  ;;  %s38_s25 = sadd.s32 1, %s1583_s21 }
  0x15   : > { %p52_p0 = scmp.ne.s32.totalorder %s1567_s17, %s1563_s16  ;;  %p53_p1 = scmp.eq.s32.totalorder %s1587_s22, 0 }
  0x16   : > { %p58_p2 = scmp.ne.s32.totalorder %s1563_s16, %s1559_s15  ;;  %p1687_p3 = scmp.eq.s32.totalorder %s1173_s23, 0 }
  0x17   : > { %p1693_p4 = por %p53_p1, %p52_p0  ;;  %p110_p5 = scmp.eq.s32.totalorder %s1173_s23, 3 }
  0x18   : > { %p1699_p6 = por %p1687_p3, %p58_p2  ;;  %p116_p7 = scmp.eq.s32.totalorder %s1174_s24, 3 }
  0x19   : > { %p1703_p8 = por %p110_p5, %p52_p0  ;;  %p1247_p10 = scmp.lt.s32.totalorder %s1587_s22, 4 }
  0x1a   : > { %p1707_p9 = por %p116_p7, %p58_p2  ;;  %s162_s5 = sand.u32 1, %s1567_s17  }
  0x1b   : > { %s2079_s30 = scalar_select %p1703_p8, 1, 0 }
  0x1c   : > { %s2081_s4 = scalar_select %p1707_p9, 1, 0 }
  0x1d   : > { %2080 = sst [smem:[#allocation17_spill]] %s2079_s30  ;;  %s1216_s6 = sshll.u32 %s1583_s21, 4 }
  0x1e   : > { %2082 = sst [smem:[#allocation18_spill]] %s2081_s4  ;;  %s1177_s7 = sshll.u32 %s162_s5, 4 }
  0x1f   : > { %s2083_s0 = sld [smem:[#allocation20_spill]]  ;;  %s166_s23 = scalar_lea.vmem [#allocation2], %s1177_s7 }
  0x20   : > { %s174_s24 = sshll.u32 %s166_s23, 4  ;;  %p1234_p11 = pnand %p1247_p10, %p1693_p4  ;;  %s175_s24 = int_to_ptr.vmem [resolvable:$true] %s174_s24 }
  0x21   : > { %p1183_p12 = scmp.ge.s32.totalorder %s1587_s22, 1  ;;  %p205_p13 = scmp.lt.s32.totalorder %s1587_s22, 5 }
  0x22   : > { %s2057_s8 = smov 128   ;;  %s2058_s7 = smov 8  }
  0x23   : > { %p1726_p0 = pnand %p1183_p12, %p205_p13  ;;  %s35_s28 = sadd.s32 1, %s1579_s20 }
  0x24   : > { %p36_p2 = scmp.ge.s32.totalorder %s35_s28, 2  ;;  %p80_p4 = scmp.ne.s32.totalorder %s1555_s14, %s1551_s13 }
  0x25   : > { %s171_s10 = scalar_lea.hbm %s2083_s0, %s1216_s6  ;;  %s163_s6 = scalar_lea.sflag [#allocation3], %s162_s5 }
  0x26   : > { %s172_s11 = sshll.u32 %s171_s10, 4  ;;  %s73_s10 = sadd.s32 1, %s1555_s14  ;;  %s173_s11 = int_to_ptr.hbm [resolvable:$true] %s172_s11 }
  0x27   : > { %1236 = dma.hbm_to_vmem [thread:$0]  (!%p1234_p11), %s173_s11, 256, %s175_s24, %s163_s6, %s2057_s8, %s2057_s8, %s2058_s7  }
  0x28   : > { %p86_p5 = scmp.ne.s32.totalorder %s1551_s13, %s1547_s12  ;;  %s2112_s28 = smov (%p36_p2, %s35_s28), 0 }
  0x29   : > { %2085 = sst [smem:[#allocation19_spill]] %s2112_s28  ;;  %s2114_s25 = smov (!%p36_p2, %s38_s25), %s1583_s21 }
  0x2a   : > { %s69_s5 = ssub.s32 %s1579_s20, %s2112_s28  ;;  %p1745_p7 = por %p80_p4, %p53_p1 }
  0x2b   : > { %p40_p11 = scmp.ge.s32.totalorder %s2114_s25, 2  ;;  %p1751_p12 = por %p86_p5, %p1687_p3 }
  0x2c   : > { %s184_s12 = sand.u32 1, %s1555_s14   ;;  %s1181_s24 = sshll.u32 %s1583_s21, 2 }
  0x2d   : > { %s2116_s25 = smov (%p40_p11, %s2114_s25), 0  ;;  %s1180_s6 = sshll.u32 %s184_s12, 4 }
  0x2e   : > { %s42_s8 = ssub.s32 %s1583_s21, %s2116_s25  ;;  %s192_s26 = sadd.s32 %s1579_s20, %s1181_s24 }
  0x2f   : > { %p43_p13 = scmp.eq.s32.totalorder %s42_s8, 0  ;;  %s70_s7 = sor.u32 %s69_s5, %s42_s8 }
  0x30   : > { %p71_p1 = scmp.eq.s32.totalorder %s70_s7, 0  ;;  %s2088_s0 = sadd.s32 1, %s1567_s17 }
  0x31   : > { %s1765_s28 = scalar_select %p43_p13, %s1567_s17, %s2088_s0  }
  0x32   : > { %s1768_s27 = scalar_select %p71_p1, %s1555_s14, %s73_s10  }
  0x33   : > { %s1182_s4 = sshll.u32 %s192_s26, 3  ;;  %s188_s15 = scalar_lea.vmem [#allocation5], %s1180_s6 }
  0x34   : > { %s197_s3 = sshll.u32 %s188_s15, 4  ;;  %s2089_s1 = sld [smem:[#allocation21_spill]]  ;;  %s198_s3 = int_to_ptr.vmem [resolvable:$true] %s197_s3 }
  0x35   : > { %p1237_p3 = pnand %p1247_p10, %p1745_p7  ;;  %s185_s8 = scalar_lea.sflag [#allocation6], %s184_s12 }
  0x36   : > { %s1591_s7 = smov 256   ;;  %s2090_s5 = smov 8  }
  0x37   : > { %s2091_s0 = smov 128   ;;  %s1782_s15 = sand.u32 (!%p1726_p0), 1, %s1563_s16  }
  0x38   : > { %209 = sbr.rel (%p1726_p0) target bundleno = 1307 (0x51b), region = 28  ;;  %s1184_s2 = sshll.u32 (!%p1726_p0), %s1782_s15, 4 }
  0x39   : > { %s1788_s26 = scalar_lea.vmem (!%p1726_p0), [#allocation2], %s1184_s2 }
  0x3a   : > { %s194_s19 = scalar_lea.hbm %s2089_s1, %s1182_s4 }
  0x3b   : > { %s195_s18 = sshll.u32 %s194_s19, 4  ;;  %s212_s19 = scalar_lea.sflag (!%p1726_p0), [#allocation3], %s1782_s15  ;;  %s196_s18 = int_to_ptr.hbm [resolvable:$true] %s195_s18 }
  0x3c   : > { %1239 = dma.hbm_to_vmem [thread:$0]  (!%p1237_p3), %s196_s18, 256, %s198_s3, %s185_s8, %s1591_s7, %s2091_s0, %s2090_s5  }
  0x3d   : > { %1530 = dma.done.wait (%p1699_p6), %s212_s19, 256  }
  0x3e   : > { %1532 = vsyncadd (%p1699_p6), %s212_s19, 4294967040  ;;  %s221_s3 = sand.u32 1, %s1551_s13  }
  0x3f   : > { %s1795_s18 = sshll.u32 %s221_s3, 4  ;;  %s222_s30 = scalar_lea.sflag [#allocation6], %s221_s3 }
  0x40   : > { %s225_s4 = scalar_lea.vmem [#allocation5], %s1795_s18 }
  0x41   : > { %1534 = dma.done.wait (%p1751_p12), %s222_s30, 256  }
  0x42   : > { %1536 = vsyncadd (%p1751_p12), %s222_s30, 4294967040  ;;  %v274_v0 = vlaneseq  ;;  %v265_v3 = vld [vmem:[%s225_s4 + $0x8] sm:$0xff]  ;;  %s1187_s29 = sshll.u32 %s1782_s15, 2  ;;  %v264_v13 = vld [vmem:[%s225_s4] sm:$0xff]  ;;  %vm445_vm2 = vcmask 130048   ;;  %vm810_vm3 = vcmask 130112  }
  0x43   : > { %v271_v4 = vmul.f32 1.0666667, %v265_v3  ;;  %vm270_vm0 = vcmp.ne.f32.partialorder %v265_v3, %v265_v3  ;;  %v267_v14 = vmul.f32 1.0666667, %v264_v13  ;;  %vm266_vm1 = vcmp.ne.f32.partialorder %v264_v13, %v264_v13  ;;  %v263_v23 = vld [vmem:[%s1788_s26 + $0x8] sm:$0xff]  ;;  %v262_v24 = vld [vmem:[%s1788_s26] sm:$0xff] }
  0x44   : > { %v1803_v1 = vshrl.u32 %v274_v0, 7  ;;  %1220 = vmatpush.msra.mxu2 %v263_v23  ;;  %1221 = vmatpush.msra.mxu3 %v263_v23  ;;  %v1839_v27 = vand.u32 127, %v274_v0  ;;  %vm833_vm4 = vcmask 1041409   ;;  %vm835_vm5 = vcmask 1042434   ;;  %s2092_s9 = sld [smem:[#allocation15_spill]]  ;;  %s1941_s11 = scalar_lea.vmem [#allocation7], %s1184_s2 }
  0x45   : > { %v1190_v5 = vadd.f32 -0.5, %v271_v4  ;;  %v1189_v17 = vadd.f32 -0.5, %v267_v14  ;;  %508 = vmatpush.msra.mxu0 %v263_v23  ;;  %1219 = vmatpush.msra.mxu1 %v263_v23  ;;  %vm837_vm6 = vcmask 1043459   ;;  %vm839_vm7 = vcmask 1044484   ;;  %s1948_s12 = scalar_lea.vmem [#allocation8], %s1187_s29 }
  0x46   : > { %1352 = vset.pattern.permute.xlu1 %v1803_v1  ;;  %1351 = vset.pattern.permute.xlu0 %v1803_v1  ;;  %v1808_v2 = vadd.s32 8, %v1803_v1  ;;  %v1842_v28 = vcvt.s32.f32 %v1839_v27  ;;  %vm841_vm8 = vcmask 1045509   ;;  %vm843_vm9 = vcmask 1046534  }
  0x47   : > { %v273_v6 = vsel %vm270_vm0, 8.999999e+09, %v1190_v5  ;;  %v1821_v18 = vsel %vm266_vm1, 8.999999e+09, %v1189_v17  ;;  %1223 = vmatpush.msra.mxu2 %v262_v24  ;;  %1224 = vmatpush.msra.mxu3 %v262_v24  ;;  %vm845_vm10 = vcmask 1047559  }
  0x48   : > { %1353 = vset.pattern.permute.xlu2 %v1808_v2  ;;  %v355_v7 = vperm.slane %v273_v6, 6  ;;  %v329_v8 = vperm.slane %v273_v6, 4  ;;  %v303_v9 = vperm.slane %v273_v6, 2  ;;  %v277_v10 = vperm.slane %v273_v6, 0  ;;  %509 = vmatpush.msra.mxu0 %v262_v24 }
  0x49   : > { %v342_v11 = vperm.slane %v273_v6, 5  ;;  %v368_v12 = vperm.slane %v273_v6, 7  ;;  %v290_v15 = vperm.slane %v273_v6, 1  ;;  %v316_v16 = vperm.slane %v273_v6, 3  ;;  %1222 = vmatpush.msra.mxu1 %v262_v24 }
  0x4a   : > { %v559_v19 = vperm.slane %v1821_v18, 0  ;;  %v611_v20 = vperm.slane %v1821_v18, 4  ;;  %v572_v21 = vperm.slane %v1821_v18, 1  ;;  %v585_v22 = vperm.slane %v1821_v18, 2  ;;  %s1188_s10 = sshll.u32 %s2092_s9, 3  ;;  %p1207_p6 = scmp.ne.s32.totalorder %s2092_s9, 1 }
  0x4b   : > { %v598_v25 = vperm.slane %v1821_v18, 3  ;;  %v624_v34 = vperm.slane %v1821_v18, 5  ;;  %v637_v48 = vperm.slane %v1821_v18, 6  ;;  %v650_v62 = vperm.slane %v1821_v18, 7  ;;  %s848_s23 = scalar_lea.vmem %s1941_s11, %s1188_s10 [#allocation7]  ;;  %s1593_s24 = smov (!%p1207_p6), 8  }
  0x4c   : > { %s1594_s6 = smov (!%p1207_p6), 127   ;;  %s1595_s8 = smov (!%p1207_p6), 126  }
  0x4d   : > { %s1596_s7 = smov (!%p1207_p6), 124   ;;  %s1597_s5 = smov (!%p1207_p6), 120  }
  0x4e   : > { %360 = vperm.xlu1 %1352, %v355_v7   ;;  %334 = vperm.xlu0 %1351, %v329_v8  }
  0x50   : > { %340 = vperm.xlu2 %1353, %v329_v8  }
  0x56   : > { %308 = vperm.xlu1 %1352, %v303_v9   ;;  %282 = vperm.xlu0 %1351, %v277_v10  }
  0x58   : > { %288 = vperm.xlu2 %1353, %v277_v10  }
  0x5e   : > { %1355 = vset.pattern.permute.xlu1 %v1808_v2  ;;  %1354 = vset.pattern.permute.xlu0 %v1808_v2 }
  0x60   : > { %1356 = vset.pattern.permute.xlu2 %v1803_v1 }
  0x66   : > { %314 = vperm.xlu1 %1355, %v303_v9   ;;  %366 = vperm.xlu0 %1354, %v355_v7  }
  0x68   : > { %347 = vperm.xlu2 %1356, %v342_v11  }
  0x6e   : > { %1357 = vset.pattern.permute.xlu1 %v1803_v1  ;;  %1358 = vset.pattern.permute.xlu0 %v1803_v1 }
  0x70   : > { %373 = vperm.xlu2 %1356, %v368_v12  }
  0x76   : > { %295 = vperm.xlu1 %1357, %v290_v15   ;;  %321 = vperm.xlu0 %1358, %v316_v16  }
  0x78   : > { %1360 = vset.pattern.permute.xlu2 %v1808_v2 }
  0x7e   : > { %1359 = vset.pattern.permute.xlu1 %v1808_v2  ;;  %564 = vperm.xlu0 %1358, %v559_v19  }
  0x80   : > { %301 = vperm.xlu2 %1360, %v290_v15  }
  0x86   : > { %353 = vperm.xlu1 %1359, %v342_v11   ;;  %616 = vperm.xlu0 %1358, %v611_v20  }
  0x88   : > { %327 = vperm.xlu2 %1360, %v316_v16  }
  0x8e   : > { %379 = vperm.xlu1 %1359, %v368_v12   ;;  %1364 = vset.pattern.permute.xlu0 %v1808_v2 }
  0x90   : > { %1361 = vset.pattern.permute.xlu2 %v1803_v1 }
  0x96   : > { %570 = vperm.xlu1 %1359, %v559_v19   ;;  %583 = vperm.xlu0 %1364, %v572_v21  }
  0x98   : > { %577 = vperm.xlu2 %1361, %v572_v21  }
  0x9e   : > { %1362 = vset.pattern.permute.xlu1 %v1803_v1  ;;  %648 = vperm.xlu0 %1364, %v637_v48  }
  0xa0   : > { %1363 = vset.pattern.permute.xlu2 %v1808_v2 }
  0xa6   : > { %590 = vperm.xlu1 %1362, %v585_v22  }
  0xa8   : > { %596 = vperm.xlu2 %1363, %v585_v22  }
  0xaa   : > { %v341_v26 = vpop.permute.xlu2 %340 }
  0xab   : > { %v390_v37 = vsub.f32 %v1842_v28, %v341_v26 }
  0xad   : > { %v406_v42 = vand.u32 2147483647, %v390_v37 }
  0xae   : > { %603 = vperm.xlu1 %1362, %v598_v25  }
  0xaf   : > { %v422_v53 = vsub.f32 1.0, %v406_v42 }
  0xb0   : > { %609 = vperm.xlu2 %1363, %v598_v25  }
  0xb1   : > { %v438_v60 = vmax.f32 %v422_v53, 0.0 }
  0xb2   : > { %v289_v33 = vpop.permute.xlu2 %288 }
  0xb3   : > { %v382_v50 = vsub.f32 %v1842_v28, %v289_v33 }
  0xb5   : > { %v398_v57 = vand.u32 2147483647, %v382_v50 }
  0xb6   : > { %1365 = vset.pattern.permute.xlu1 %v1808_v2 }
  0xb7   : > { %v414_v63 = vsub.f32 1.0, %v398_v57 }
  0xb8   : > { %1366 = vset.pattern.permute.xlu2 %v1803_v1 }
  0xb9   : > { %v430_v4 = vmax.f32 %v414_v63, 0.0 }
  0xbe   : > { %622 = vperm.xlu1 %1365, %v611_v20  }
  0xc0   : > { %v361_v29 = vpop.permute.xlu1 %360  ;;  %v335_v30 = vpop.permute.xlu0 %334  ;;  %629 = vperm.xlu2 %1366, %v624_v34  }
  0xc1   : > { %v393_v31 = vsub.f32 %v1842_v28, %v361_v29  ;;  %v389_v32 = vsub.f32 %v1842_v28, %v335_v30 }
  0xc2   : > { %v348_v47 = vpop.permute.xlu2 %347 }
  0xc3   : > { %v409_v35 = vand.u32 2147483647, %v393_v31  ;;  %v405_v36 = vand.u32 2147483647, %v389_v32  ;;  %v391_v49 = vsub.f32 %v1842_v28, %v348_v47 }
  0xc5   : > { %v425_v38 = vsub.f32 1.0, %v409_v35  ;;  %v421_v39 = vsub.f32 1.0, %v405_v36  ;;  %v407_v56 = vand.u32 2147483647, %v391_v49 }
  0xc6   : > { %635 = vperm.xlu1 %1365, %v624_v34  }
  0xc7   : > { %v441_v40 = vmax.f32 %v425_v38, 0.0  ;;  %v437_v41 = vmax.f32 %v421_v39, 0.0  ;;  %v423_v61 = vsub.f32 1.0, %v407_v56 }
  0xc8   : > { %v309_v43 = vpop.permute.xlu1 %308  ;;  %v283_v44 = vpop.permute.xlu0 %282  ;;  %642 = vperm.xlu2 %1366, %v637_v48  }
  0xc9   : > { %v385_v45 = vsub.f32 %v1842_v28, %v309_v43  ;;  %v381_v46 = vsub.f32 %v1842_v28, %v283_v44  ;;  %1199 = vmatmul.msk.f32.vlgmr.msra.gmra.mxu2 %vm445_vm2, %v437_v41  ;;  %1203 = vmatmul.msk.f32.vlgmr.msra.gmra.mxu3 %vm445_vm2, %v441_v40  ;;  %v439_v3 = vmax.f32 %v423_v61, 0.0 }
  0xca   : > { %v374_v0 = vpop.permute.xlu2 %373 }
  0xcb   : > { %v401_v51 = vand.u32 2147483647, %v385_v45  ;;  %v397_v52 = vand.u32 2147483647, %v381_v46  ;;  %v395_v11 = vsub.f32 %v1842_v28, %v374_v0 }
  0xcd   : > { %v417_v54 = vsub.f32 1.0, %v401_v51  ;;  %v413_v55 = vsub.f32 1.0, %v397_v52  ;;  %v411_v16 = vand.u32 2147483647, %v395_v11 }
  0xce   : > { %1367 = vset.pattern.permute.xlu1 %v1803_v1 }
  0xcf   : > { %v433_v58 = vmax.f32 %v417_v54, 0.0  ;;  %v429_v59 = vmax.f32 %v413_v55, 0.0  ;;  %v427_v17 = vsub.f32 1.0, %v411_v16 }
  0xd0   : > { %1368 = vset.pattern.permute.xlu2 %v1808_v2 }
  0xd1   : > { %1191 = vmatmul.msk.f32.vlgmr.msra.gmra.mxu0 %vm445_vm2, %v429_v59  ;;  %1195 = vmatmul.msk.f32.vlgmr.msra.gmra.mxu1 %vm445_vm2, %v433_v58  ;;  %v443_v19 = vmax.f32 %v427_v17, 0.0 }
  0xd2   : > { %1200 = vmatmul.msk.f32.gmra.mxu2 %vm445_vm2, %v438_v60 }
  0xd6   : > { %655 = vperm.xlu1 %1367, %v650_v62  }
  0xd8   : > { %v315_v5 = vpop.permute.xlu1 %314  ;;  %v367_v6 = vpop.permute.xlu0 %366  ;;  %661 = vperm.xlu2 %1368, %v650_v62  }
  0xd9   : > { %v386_v7 = vsub.f32 %v1842_v28, %v315_v5  ;;  %v394_v8 = vsub.f32 %v1842_v28, %v367_v6  ;;  %1192 = vmatmul.msk.f32.gmra.mxu0 %vm445_vm2, %v430_v4 }
  0xda   : > { %1201 = vmatmul.msk.f32.gmra.mxu2 %vm445_vm2, %v439_v3  ;;  %v302_v2 = vpop.permute.xlu2 %301 }
  0xdb   : > { %v402_v9 = vand.u32 2147483647, %v386_v7  ;;  %v410_v10 = vand.u32 2147483647, %v394_v8  ;;  %v384_v23 = vsub.f32 %v1842_v28, %v302_v2 }
  0xdd   : > { %v418_v12 = vsub.f32 1.0, %v402_v9  ;;  %v426_v13 = vsub.f32 1.0, %v410_v10  ;;  %v400_v31 = vand.u32 2147483647, %v384_v23 }
  0xdf   : > { %v434_v14 = vmax.f32 %v418_v12, 0.0  ;;  %v442_v15 = vmax.f32 %v426_v13, 0.0  ;;  %v416_v36 = vsub.f32 1.0, %v400_v31 }
  0xe1   : > { %1196 = vmatmul.msk.f32.gmra.mxu1 %vm445_vm2, %v434_v14  ;;  %1204 = vmatmul.msk.f32.gmra.mxu3 %vm445_vm2, %v442_v15  ;;  %v432_v38 = vmax.f32 %v416_v36, 0.0 }
  0xe2   : > { %v328_v18 = vpop.permute.xlu2 %327 }
  0xe3   : > { %v388_v25 = vsub.f32 %v1842_v28, %v328_v18 }
  0xe5   : > { %v404_v33 = vand.u32 2147483647, %v388_v25 }
  0xe7   : > { %v420_v37 = vsub.f32 1.0, %v404_v33 }
  0xe8   : > { %v296_v20 = vpop.permute.xlu1 %295  ;;  %v322_v21 = vpop.permute.xlu0 %321 }
  0xe9   : > { %v383_v22 = vsub.f32 %v1842_v28, %v296_v20  ;;  %v387_v24 = vsub.f32 %v1842_v28, %v322_v21  ;;  %1205 = vmatmul.msk.f32.gmra.mxu3 %vm445_vm2, %v443_v19  ;;  %v436_v39 = vmax.f32 %v420_v37, 0.0 }
  0xeb   : > { %v399_v26 = vand.u32 2147483647, %v383_v22  ;;  %v403_v29 = vand.u32 2147483647, %v387_v24 }
  0xed   : > { %v415_v30 = vsub.f32 1.0, %v399_v26  ;;  %v419_v32 = vsub.f32 1.0, %v403_v29 }
  0xef   : > { %v431_v34 = vmax.f32 %v415_v30, 0.0  ;;  %v435_v35 = vmax.f32 %v419_v32, 0.0 }
  0xf0   : > { %v565_v56 = vpop.permute.xlu0 %564 }
  0xf1   : > { %1193 = vmatmul.msk.f32.gmra.mxu0 %vm445_vm2, %v431_v34  ;;  %1197 = vmatmul.msk.f32.gmra.mxu1 %vm445_vm2, %v435_v35  ;;  %v663_v62 = vsub.f32 %v1842_v28, %v565_v56 }
  0xf2   : > { %v1881_v50 = vpop.permute.xlu2 %577 }
  0xf3   : > { %v679_v4 = vand.u32 2147483647, %v663_v62 }
  0xf5   : > { %v695_v9 = vsub.f32 1.0, %v679_v4 }
  0xf7   : > { %v711_v14 = vmax.f32 %v695_v9, 0.0 }
  0xf8   : > { %v354_v40 = vpop.permute.xlu1 %353  ;;  %v617_v59 = vpop.permute.xlu0 %616 }
  0xf9   : > { %v392_v41 = vsub.f32 %v1842_v28, %v354_v40  ;;  %1194 = vmatmul.msk.f32.gmra.mxu0 %vm445_vm2, %v432_v38  ;;  %1198 = vmatmul.msk.f32.gmra.mxu1 %vm445_vm2, %v436_v39  ;;  %v671_v61 = vsub.f32 %v1842_v28, %v617_v59  ;;  %v665_v59 = vsub.f32 %v1842_v28, %v1881_v50 }
  0xfb   : > { %v408_v42 = vand.u32 2147483647, %v392_v41  ;;  %v687_v0 = vand.u32 2147483647, %v671_v61  ;;  %v681_v61 = vand.u32 2147483647, %v665_v59 }
  0xfd   : > { %v424_v43 = vsub.f32 1.0, %v408_v42  ;;  %v703_v8 = vsub.f32 1.0, %v687_v0  ;;  %v697_v0 = vsub.f32 1.0, %v681_v61 }
  0xff   : > { %v440_v44 = vmax.f32 %v424_v43, 0.0  ;;  %v719_v13 = vmax.f32 %v703_v8, 0.0 }
 0x100   : > { %v380_v45 = vpop.permute.xlu1 %379 }
 0x101   : > { %v396_v46 = vsub.f32 %v1842_v28, %v380_v45  ;;  %1202 = vmatmul.msk.f32.gmra.mxu2 %vm445_vm2, %v440_v44 }
 0x102   : > { %v597_v51 = vpop.permute.xlu2 %596 }
 0x103   : > { %v412_v47 = vand.u32 2147483647, %v396_v46  ;;  %v668_v30 = vsub.f32 %v1842_v28, %v597_v51 }
 0x105   : > { %v428_v48 = vsub.f32 1.0, %v412_v47  ;;  %v684_v37 = vand.u32 2147483647, %v668_v30 }
 0x107   : > { %v444_v49 = vmax.f32 %v428_v48, 0.0  ;;  %v700_v45 = vsub.f32 1.0, %v684_v37 }
 0x108   : > { %v571_v53 = vpop.permute.xlu1 %570  ;;  %v584_v56 = vpop.permute.xlu0 %583 }
 0x109   : > { %1206 = vmatmul.msk.f32.gmra.mxu3 %vm445_vm2, %v444_v49  ;;  %v664_v10 = vsub.f32 %v1842_v28, %v571_v53  ;;  %v716_v49 = vmax.f32 %v700_v45, 0.0 }
 0x10a   : > { %v1883_v52 = vpop.permute.xlu2 %609 }
 0x10b   : > { %v680_v17 = vand.u32 2147483647, %v664_v10 }
 0x10d   : > { %v696_v29 = vsub.f32 1.0, %v680_v17 }
 0x10f   : > { %v712_v36 = vmax.f32 %v696_v29, 0.0 }
 0x110   : > { %v649_v4 = vpop.permute.xlu0 %648 }
 0x111   : > { %v676_v9 = vsub.f32 %v1842_v28, %v649_v4 }
 0x118   : > { %v591_v54 = vpop.permute.xlu1 %590 }
 0x119   : > { %v667_v5 = vsub.f32 %v1842_v28, %v591_v54 }
 0x11a   : > { %v630_v55 = vpop.permute.xlu2 %629 }
 0x11b   : > { %v683_v11 = vand.u32 2147483647, %v667_v5  ;;  %v673_v21 = vsub.f32 %v1842_v28, %v630_v55 }
 0x11d   : > { %v699_v18 = vsub.f32 1.0, %v683_v11  ;;  %v689_v33 = vand.u32 2147483647, %v673_v21 }
 0x11f   : > { %v715_v31 = vmax.f32 %v699_v18, 0.0  ;;  %v705_v40 = vsub.f32 1.0, %v689_v33 }
 0x120   : > { %v1885_v57 = vpop.permute.xlu1 %603 }
 0x121   : > { %v721_v48 = vmax.f32 %v705_v40, 0.0  ;;  %v669_v62 = vsub.f32 %v1842_v28, %v1885_v57 }
 0x122   : > { %v643_v58 = vpop.permute.xlu2 %642 }
 0x123   : > { %v675_v60 = vsub.f32 %v1842_v28, %v643_v58  ;;  %v685_v5 = vand.u32 2147483647, %v669_v62 }
 0x125   : > { %v691_v63 = vand.u32 2147483647, %v675_v60 }
 0x127   : > { %v707_v6 = vsub.f32 1.0, %v691_v63  ;;  %v666_v63 = vsub.f32 %v1842_v28, %v584_v56 }
 0x129   : > { %v723_v2 = vmax.f32 %v707_v6, 0.0  ;;  %v682_v6 = vand.u32 2147483647, %v666_v63 }
 0x130   : > { %v623_v3 = vpop.permute.xlu1 %622 }
 0x131   : > { %v672_v7 = vsub.f32 %v1842_v28, %v623_v3  ;;  %v670_v3 = vsub.f32 %v1842_v28, %v1883_v52 }
 0x132   : > { %v662_v33 = vpop.permute.xlu2 %661 }
 0x133   : > { %v688_v12 = vand.u32 2147483647, %v672_v7  ;;  %v713_v7 = vmax.f32 %v697_v0, 0.0  ;;  %v686_v8 = vand.u32 2147483647, %v670_v3  ;;  %v678_v37 = vsub.f32 %v1842_v28, %v662_v33 }
 0x135   : > { %v704_v22 = vsub.f32 1.0, %v688_v12  ;;  %v698_v12 = vsub.f32 1.0, %v682_v6  ;;  %v702_v57 = vsub.f32 1.0, %v686_v8  ;;  %v808_v6 = vadd.s32 4294967288, %v1839_v27 }
 0x137   : > { %v720_v34 = vmax.f32 %v704_v22, 0.0  ;;  %v714_v52 = vmax.f32 %v698_v12, 0.0  ;;  %v718_v17 = vmax.f32 %v702_v57, 0.0 }
 0x138   : > { %v636_v50 = vpop.permute.xlu1 %635 }
 0x139   : > { %v674_v22 = vsub.f32 %v1842_v28, %v636_v50 }
 0x14c   : > { %v535_v15 = vpop.f32.mrf.mxu2  ;;  %v547_v16 = vpop.f32.mrf.mxu3 }
 0x14d   : > { %v735_v19 = vmul.f32 %v719_v13, %v535_v15  ;;  %v739_v20 = vmul.f32 %v723_v2, %v547_v16  ;;  %v701_v2 = vsub.f32 1.0, %v685_v5 }
 0x14e   : > { %v511_v23 = vpop.f32.mrf.mxu0  ;;  %v523_v35 = vpop.f32.mrf.mxu1 }
 0x14f   : > { %v727_v24 = vmul.f32 %v711_v14, %v511_v23  ;;  %v779_v25 = vsel %vm445_vm2, %v739_v20, 0.0  ;;  %v767_v26 = vsel %vm445_vm2, %v735_v19, 0.0  ;;  %v731_v38 = vmul.f32 %v715_v31, %v523_v35 }
 0x150   : > { %780 = vadd.xlane.f32.xlu0 %v779_v25  ;;  %768 = vadd.xlane.f32.xlu2 %v767_v26  ;;  %v692_v14 = vand.u32 2147483647, %v676_v9  ;;  %v717_v16 = vmax.f32 %v701_v2, 0.0  ;;  %v656_v25 = vpop.permute.xlu1 %655 }
 0x151   : > { %v743_v32 = vsel %vm445_vm2, %v727_v24, 0.0  ;;  %v755_v46 = vsel %vm445_vm2, %v731_v38, 0.0  ;;  %v677_v35 = vsub.f32 %v1842_v28, %v656_v25 }
 0x152   : > { %744 = vadd.xlane.f32.xlu1 %v743_v32  ;;  %v708_v18 = vsub.f32 1.0, %v692_v14 }
 0x154   : > { %v724_v26 = vmax.f32 %v708_v18, 0.0 }
 0x155   : > { %v538_v39 = vpop.f32.mrf.mxu2 }
 0x156   : > { %v736_v41 = vmul.f32 %v720_v34, %v538_v39  ;;  %v514_v42 = vpop.f32.mrf.mxu0  ;;  %v690_v34 = vand.u32 2147483647, %v674_v22  ;;  %v693_v39 = vand.u32 2147483647, %v677_v35 }
 0x157   : > { %v728_v43 = vmul.f32 %v712_v36, %v514_v42 }
 0x158   : > { %v770_v44 = vsel %vm445_vm2, %v736_v41, 0.0  ;;  %v706_v38 = vsub.f32 1.0, %v690_v34  ;;  %v694_v41 = vand.u32 2147483647, %v678_v37 }
 0x159   : > { %771 = vadd.xlane.f32.xlu0 %v770_v44  ;;  %v746_v47 = vsel %vm445_vm2, %v728_v43, 0.0  ;;  %v709_v43 = vsub.f32 1.0, %v693_v39 }
 0x15a   : > { %756 = vadd.xlane.f32.xlu1 %v755_v46  ;;  %747 = vadd.xlane.f32.xlu2 %v746_v47  ;;  %v722_v42 = vmax.f32 %v706_v38, 0.0  ;;  %v710_v46 = vsub.f32 1.0, %v694_v41 }
 0x15d   : > { %v541_v51 = vpop.f32.mrf.mxu2 }
 0x15e   : > { %v526_v53 = vpop.f32.mrf.mxu1  ;;  %v737_v54 = vmul.f32 %v721_v48, %v541_v51  ;;  %v725_v48 = vmax.f32 %v709_v43, 0.0  ;;  %v726_v51 = vmax.f32 %v710_v46, 0.0 }
 0x15f   : > { %v732_v55 = vmul.f32 %v716_v49, %v526_v53 }
 0x160   : > { %v773_v58 = vsel %vm445_vm2, %v737_v54, 0.0 }
 0x161   : > { %v758_v60 = vsel %vm445_vm2, %v732_v55, 0.0 }
 0x162   : > { %759 = vadd.xlane.f32.xlu2 %v758_v60  ;;  %774 = vadd.xlane.f32.xlu1 %v773_v58 }
 0x164   : > { %v550_v32 = vpop.f32.mrf.mxu3 }
 0x165   : > { %v740_v36 = vmul.f32 %v724_v26, %v550_v32 }
 0x167   : > { %v782_v40 = vsel %vm445_vm2, %v740_v36, 0.0 }
 0x16c   : > { %v553_v44 = vpop.f32.mrf.mxu3 }
 0x16d   : > { %v741_v53 = vmul.f32 %v725_v48, %v553_v44 }
 0x16e   : > { %v517_v10 = vpop.f32.mrf.mxu0  ;;  %v529_v11 = vpop.f32.mrf.mxu1 }
 0x16f   : > { %v729_v13 = vmul.f32 %v713_v7, %v517_v10  ;;  %v733_v19 = vmul.f32 %v717_v16, %v529_v11  ;;  %v785_v56 = vsel %vm445_vm2, %v741_v53, 0.0 }
 0x171   : > { %v749_v15 = vsel %vm445_vm2, %v729_v13, 0.0  ;;  %v761_v30 = vsel %vm445_vm2, %v733_v19, 0.0 }
 0x172   : > { %750 = vadd.xlane.f32.xlu0 %v749_v15 }
 0x176   : > { %v520_v20 = vpop.f32.mrf.mxu0  ;;  %v532_v21 = vpop.f32.mrf.mxu1 }
 0x177   : > { %v730_v23 = vmul.f32 %v714_v52, %v520_v20  ;;  %v734_v24 = vmul.f32 %v718_v17, %v532_v21 }
 0x179   : > { %v764_v29 = vsel %vm445_vm2, %v734_v24, 0.0  ;;  %v752_v31 = vsel %vm445_vm2, %v730_v23, 0.0 }
 0x17a   : > { %765 = vadd.xlane.f32.xlu1 %v764_v29  ;;  %762 = vadd.xlane.f32.xlu0 %v761_v30 }
 0x17b   : > { %753 = vadd.xlane.f32.xlu2 %v752_v31 }
 0x182   : > { %783 = vadd.xlane.f32.xlu1 %v782_v40 }
 0x184   : > { %v544_v45 = vpop.f32.mrf.mxu2 }
 0x185   : > { %v738_v47 = vmul.f32 %v722_v42, %v544_v45 }
 0x187   : > { %v776_v49 = vsel %vm445_vm2, %v738_v47, 0.0 }
 0x188   : > { %777 = vadd.xlane.f32.xlu2 %v776_v49 }
 0x18c   : > { %v556_v54 = vpop.f32.mrf.mxu3 }
 0x18d   : > { %v742_v28 = vmul.f32 %v726_v51, %v556_v54 }
 0x18f   : > { %v788_v55 = vsel %vm445_vm2, %v742_v28, 0.0 }
 0x190   : > { %789 = vadd.xlane.f32.xlu0 %v788_v55  ;;  %786 = vadd.xlane.f32.xlu2 %v785_v56 }
 0x1c3   : > { %v769_v58 = vpop.xlane.xlu2 %768  ;;  %v781_v60 = vpop.xlane.xlu0 %780 }
 0x1c4   : > { %v821_v24 = vperm.slane %v769_v58, %v1839_v27  ;;  %v827_v32 = vperm.slane %v781_v60, %v1839_v27 }
 0x1c5   : > { %v745_v59 = vpop.xlane.xlu1 %744 }
 0x1c6   : > { %v807_v10 = vperm.slane %v745_v59, %v1839_v27 }
 0x1cc   : > { %v772_v63 = vpop.xlane.xlu0 %771 }
 0x1cd   : > { %v748_v61 = vpop.xlane.xlu2 %747  ;;  %v757_v62 = vpop.xlane.xlu1 %756  ;;  %v822_v20 = vperm.slane %v772_v63, %v808_v6 }
 0x1ce   : > { %v809_v8 = vperm.slane %v748_v61, %v808_v6  ;;  %v815_v57 = vperm.slane %v757_v62, %v1839_v27 }
 0x1cf   : > { %v823_v29 = vsel %vm810_vm3, %v822_v20, %v821_v24 }
 0x1d0   : > { %v811_v13 = vsel %vm810_vm3, %v809_v8, %v807_v10 }
 0x1d5   : > { %v760_v0 = vpop.xlane.xlu2 %759  ;;  %v775_v3 = vpop.xlane.xlu1 %774 }
 0x1d6   : > { %v816_v2 = vperm.slane %v760_v0, %v808_v6  ;;  %v824_v21 = vperm.slane %v775_v3, %v1839_v27 }
 0x1d8   : > { %v817_v52 = vsel %vm810_vm3, %v816_v2, %v815_v57 }
 0x1e5   : > { %v751_v4 = vpop.xlane.xlu0 %750 }
 0x1e6   : > { %v812_v50 = vperm.slane %v751_v4, %v1839_v27 }
 0x1ed   : > { %v766_v9 = vpop.xlane.xlu1 %765  ;;  %v763_v12 = vpop.xlane.xlu0 %762 }
 0x1ee   : > { %v754_v5 = vpop.xlane.xlu2 %753  ;;  %v819_v15 = vperm.slane %v766_v9, %v808_v6  ;;  %v818_v16 = vperm.slane %v763_v12, %v1839_v27 }
 0x1ef   : > { %v813_v7 = vperm.slane %v754_v5, %v808_v6 }
 0x1f0   : > { %v820_v22 = vsel %vm810_vm3, %v819_v15, %v818_v16 }
 0x1f1   : > { %v814_v11 = vsel %vm810_vm3, %v813_v7, %v812_v50 }
 0x1f2   : > { %v834_v14 = vsel %vm833_vm4, %v814_v11, %v811_v13 }
 0x1f3   : > { %v836_v18 = vsel %vm835_vm5, %v817_v52, %v834_v14 }
 0x1f4   : > { %v838_v25 = vsel %vm837_vm6, %v820_v22, %v836_v18 }
 0x1f5   : > { %v784_v23 = vpop.xlane.xlu1 %783  ;;  %v840_v31 = vsel %vm839_vm7, %v823_v29, %v838_v25 }
 0x1f6   : > { %v828_v30 = vperm.slane %v784_v23, %v808_v6 }
 0x1f8   : > { %v829_v38 = vsel %vm810_vm3, %v828_v30, %v827_v32 }
 0x1fb   : > { %v778_v17 = vpop.xlane.xlu2 %777 }
 0x1fc   : > { %v825_v19 = vperm.slane %v778_v17, %v808_v6 }
 0x1fe   : > { %v826_v26 = vsel %vm810_vm3, %v825_v19, %v824_v21 }
 0x1ff   : > { %v842_v33 = vsel %vm841_vm8, %v826_v26, %v840_v31 }
 0x200   : > { %v844_v39 = vsel %vm843_vm9, %v829_v38, %v842_v33 }
 0x203   : > { %v790_v34 = vpop.xlane.xlu0 %789  ;;  %v787_v35 = vpop.xlane.xlu2 %786 }
 0x204   : > { %v831_v36 = vperm.slane %v790_v34, %v808_v6  ;;  %v830_v37 = vperm.slane %v787_v35, %v1839_v27  ;;  %853 = sbr.rel (%p1207_p6) target bundleno = 1263 (0x4ef), region = 40 }
 0x206   : > { %v832_v40 = vsel %vm810_vm3, %v831_v36, %v830_v37 }
 0x207   : > { %v846_v41 = vsel %vm845_vm10, %v832_v40, %v844_v39 }
 0x208   : > { %849 = vst.msk [vmem:[%s848_s23] sm:$0xff] %vm445_vm2, %v846_v41 }
 0x209   : > { %v1592_v42 = vmov -inf   ;;  %vm868_vm11 = vcmask 64512   ;;  %vm872_vm12 = vcmask 195584   ;;  %vm926_vm13 = vcmp.lt.s32.totalorder %v1803_v1, 7 }
 0x20a   : > { %859 = vrot.lane.b32.xlu0 %v1592_v42, %s1593_s24  ;;  %vm938_vm14 = vcmp.lt.s32.totalorder %v1803_v1, 6  ;;  %vm951_vm15 = vcmp.lt.s32.totalorder %v1803_v1, 4  ;;  %vm988_vm8 = vcmask 123904  }
 0x20f   : > { %v1952_v27 = vld [vmem:[%s1941_s11 + $0x8] sm:$0xff]  ;;  %v1956_v43 = vld [vmem:[%s1941_s11] sm:$0xff] }
 0x210   : > { %863 = vrot.lane.b32.xlu1 %v1952_v27, %s1593_s24  ;;  %vm972_vm0 = vcmp.ge.f32.partialorder %v1956_v43, 0.0  ;;  %vm973_vm1 = vcmp.ge.f32.partialorder %v1952_v27, 0.0 }
 0x212   : > { %861 = vrot.lane.b32.xlu0 %v1956_v43, %s1593_s24 }
 0x27c   : > { %v860_v44 = vpop.permute.xlu0 %859 }
 0x27d   : > { %v869_v45 = vsel %vm868_vm11, -inf, %v860_v44 }
 0x27e   : > { %v873_v46 = vsel %vm872_vm12, %v869_v45, -inf }
 0x27f   : > { %876 = vrot.lane.b32.xlu1 %v873_v46, %s1594_s6 }
 0x282   : > { %v864_v51 = vpop.permute.xlu1 %863 }
 0x283   : > { %v871_v53 = vsel %vm868_vm11, -inf, %v864_v51 }
 0x284   : > { %v862_v47 = vpop.permute.xlu0 %861  ;;  %v875_v54 = vsel %vm872_vm12, %v871_v53, -inf }
 0x285   : > { %v870_v48 = vsel %vm868_vm11, -inf, %v862_v47 }
 0x286   : > { %v874_v49 = vsel %vm872_vm12, %v870_v48, -inf }
 0x287   : > { %878 = vrot.lane.b32.xlu2 %v874_v49, %s1594_s6 }
 0x28f   : > { %880 = vrot.lane.b32.xlu2 %v875_v54, %s1594_s6 }
 0x2e1   : > { %v879_v28 = vpop.permute.xlu2 %878 }
 0x2e2   : > { %v883_v55 = vmax.f32 %v874_v49, %v879_v28 }
 0x2e4   : > { %887 = vrot.lane.b32.xlu1 %v883_v55, %s1595_s8 }
 0x2e9   : > { %v881_v56 = vpop.permute.xlu2 %880 }
 0x2ea   : > { %v884_v58 = vmax.f32 %v875_v54, %v881_v56 }
 0x2ec   : > { %889 = vrot.lane.b32.xlu2 %v884_v58, %s1595_s8 }
 0x2f1   : > { %v877_v59 = vpop.permute.xlu1 %876 }
 0x2f2   : > { %v882_v60 = vmax.f32 %v873_v46, %v877_v59 }
 0x2f4   : > { %885 = vrot.lane.b32.xlu0 %v882_v60, %s1595_s8 }
 0x346   : > { %v890_v61 = vpop.permute.xlu2 %889 }
 0x347   : > { %v893_v62 = vmax.f32 %v884_v58, %v890_v61 }
 0x349   : > { %898 = vrot.lane.b32.xlu2 %v893_v62, %s1596_s7 }
 0x356   : > { %v888_v63 = vpop.permute.xlu1 %887 }
 0x357   : > { %v892_v0 = vmax.f32 %v883_v55, %v888_v63 }
 0x359   : > { %896 = vrot.lane.b32.xlu1 %v892_v0, %s1596_s7 }
 0x366   : > { %v886_v3 = vpop.permute.xlu0 %885 }
 0x367   : > { %v891_v4 = vmax.f32 %v882_v60, %v886_v3 }
 0x369   : > { %894 = vrot.lane.b32.xlu0 %v891_v4, %s1596_s7 }
 0x3a3   : > { %v899_v5 = vpop.permute.xlu2 %898 }
 0x3a4   : > { %v902_v6 = vmax.f32 %v893_v62, %v899_v5 }
 0x3a6   : > { %907 = vrot.lane.b32.xlu2 %v902_v6, %s1597_s5 }
 0x3cb   : > { %v897_v7 = vpop.permute.xlu1 %896 }
 0x3cc   : > { %v901_v8 = vmax.f32 %v892_v0, %v897_v7 }
 0x3ce   : > { %905 = vrot.lane.b32.xlu1 %v901_v8, %s1597_s5 }
 0x3db   : > { %v895_v50 = vpop.permute.xlu0 %894 }
 0x3dc   : > { %v900_v9 = vmax.f32 %v891_v4, %v895_v50 }
 0x3de   : > { %903 = vrot.lane.b32.xlu0 %v900_v9, %s1597_s5 }
 0x400   : > { %v908_v10 = vpop.permute.xlu2 %907 }
 0x401   : > { %v911_v11 = vmax.f32 %v902_v6, %v908_v10  ;;  %v1598_v6 = vmov 0  }
 0x403   : > { %916 = vrot.lane.b32.xlu2 %v911_v11, %s1594_s6 }
 0x440   : > { %v906_v2 = vpop.permute.xlu1 %905 }
 0x441   : > { %v910_v12 = vmax.f32 %v901_v8, %v906_v2 }
 0x443   : > { %914 = vrot.lane.b32.xlu1 %v910_v12, %s1594_s6 }
 0x450   : > { %v904_v13 = vpop.permute.xlu0 %903 }
 0x451   : > { %v909_v57 = vmax.f32 %v900_v9, %v904_v13 }
 0x453   : > { %912 = vrot.lane.b32.xlu0 %v909_v57, %s1594_s6 }
 0x45d   : > { %v917_v15 = vpop.permute.xlu2 %916 }
 0x45e   : > { %v920_v52 = vmax.f32 %v875_v54, %v917_v15 }
 0x460   : > { %v923_v18 = vrot.slane %v920_v52, 1 }
 0x4b5   : > { %v915_v14 = vpop.permute.xlu1 %914 }
 0x4b6   : > { %v919_v16 = vmax.f32 %v874_v49, %v915_v14 }
 0x4b8   : > { %v922_v17 = vrot.slane %v919_v16, 1 }
 0x4ba   : > { %v928_v20 = vsel %vm926_vm13, %v922_v17, %v923_v18 }
 0x4bb   : > { %v931_v23 = vmax.f32 %v919_v16, %v928_v20 }
 0x4bd   : > { %v935_v32 = vrot.slane %v931_v23, 2 }
 0x4c5   : > { %v913_v19 = vpop.permute.xlu0 %912 }
 0x4c6   : > { %v918_v21 = vmax.f32 %v873_v46, %v913_v19 }
 0x4c8   : > { %v921_v22 = vrot.slane %v918_v21, 1 }
 0x4ca   : > { %v927_v24 = vsel %vm926_vm13, %v923_v18, %v921_v22  ;;  %v929_v25 = vsel %vm926_vm13, %v921_v22, %v922_v17  ;;  %v933_v26 = vmax.f32 %v918_v21, %v921_v22 }
 0x4cb   : > { %v930_v29 = vmax.f32 %v918_v21, %v929_v25  ;;  %v932_v30 = vmax.f32 %v920_v52, %v927_v24 }
 0x4cc   : > { %v937_v31 = vrot.slane %v933_v26, 2 }
 0x4cd   : > { %v934_v33 = vrot.slane %v930_v29, 2  ;;  %v936_v34 = vrot.slane %v932_v30, 2 }
 0x4cf   : > { %v939_v35 = vsel %vm938_vm14, %v936_v34, %v937_v31  ;;  %v940_v36 = vsel %vm938_vm14, %v935_v32, %v936_v34  ;;  %v941_v37 = vsel %vm938_vm14, %v934_v33, %v935_v32  ;;  %v942_v38 = vsel %vm938_vm14, %v937_v31, %v934_v33 }
 0x4d0   : > { %v943_v39 = vmax.f32 %v930_v29, %v941_v37  ;;  %v944_v40 = vmax.f32 %v931_v23, %v940_v36  ;;  %v945_v41 = vmax.f32 %v932_v30, %v939_v35  ;;  %v946_v42 = vmax.f32 %v933_v26, %v942_v38 }
 0x4d2   : > { %v947_v44 = vrot.slane %v943_v39, 4  ;;  %v948_v45 = vrot.slane %v944_v40, 4  ;;  %v949_v46 = vrot.slane %v945_v41, 4  ;;  %v950_v47 = vrot.slane %v946_v42, 4 }
 0x4d4   : > { %v952_v48 = vsel %vm951_vm15, %v949_v46, %v950_v47  ;;  %v953_v49 = vsel %vm951_vm15, %v948_v45, %v949_v46  ;;  %v954_v51 = vsel %vm951_vm15, %v947_v44, %v948_v45  ;;  %v955_v53 = vsel %vm951_vm15, %v950_v47, %v947_v44 }
 0x4d5   : > { %v956_v54 = vmax.f32 %v943_v39, %v954_v51  ;;  %v957_v28 = vmax.f32 %v944_v40, %v953_v49  ;;  %v958_v55 = vmax.f32 %v945_v41, %v952_v48  ;;  %v959_v56 = vmax.f32 %v946_v42, %v955_v53 }
 0x4d7   : > { %v960_v58 = vmax.f32 %v956_v54, %v957_v28  ;;  %v961_v59 = vmax.f32 %v957_v28, %v958_v55  ;;  %v962_v60 = vmax.f32 %v958_v55, %v959_v56 }
 0x4d9   : > { %v963_v61 = vrot.slane %v960_v58, 1  ;;  %v964_v62 = vrot.slane %v961_v59, 1  ;;  %v965_v63 = vrot.slane %v962_v60, 1 }
 0x4db   : > { %v966_v0 = vsel %vm926_vm13, %v964_v62, %v965_v63  ;;  %v967_v3 = vsel %vm926_vm13, %v963_v61, %v964_v62 }
 0x4dc   : > { %v968_v4 = vmax.f32 %v918_v21, %v967_v3  ;;  %v969_v5 = vmax.f32 %v919_v16, %v966_v0 }
 0x4de   : > { %vm970_vm2 = vcmp.eq.f32.partialorder %v1956_v43, %v968_v4  ;;  %vm971_vm3 = vcmp.eq.f32.partialorder %v1952_v27, %v969_v5 }
 0x4df   : > { %vm974_vm4 = vmand %vm970_vm2, %vm972_vm0 }
 0x4e0   : > { %vm975_vm5 = vmand %vm971_vm3, %vm973_vm1 }
 0x4e1   : > { %vm976_vm6 = vmpackc.low %vm975_vm5, %vm974_vm4 }
 0x4e2   : > { %v977_v7 = vsel %vm976_vm6, 16711935, %v1598_v6 }
 0x4e3   : > { %v979_v8 = vpack.c.b8 %v977_v7, %v977_v7 }
 0x4e5   : > { %vm980_vm7 = vnez %v979_v8 }
 0x4e6   : > { %v981_v1 = vsel %vm980_vm7, 16843009, %v1598_v6 }
 0x4e7   : > { %v982_v50 = vunpack.c.0.s8 %v981_v1  ;;  %v983_v9 = vunpack.c.1.s8 %v981_v1 }
 0x4e9   : > { %v984_v10 = vpack.c.b16 %v982_v50, %v982_v50  ;;  %v986_v11 = vpack.c.b16 %v983_v9, %v983_v9 }
 0x4eb   : > { %v985_v2 = vpack.c.b8 %v984_v10, %v984_v10  ;;  %v987_v12 = vpack.c.b8 %v986_v11, %v986_v11 }
 0x4ed   : > { %989 = vst.msk [vmem:[%s1948_s12] sm:$0x3] %vm988_vm8, %v985_v2 }
 0x4ee   : > { %990 = vst.msk [vmem:[%s1948_s12 + $0x2] sm:$0x3] %vm988_vm8, %v987_v12 }
 0x4ef PF: > { %s2093_s0 = sld [smem:[#allocation16_spill]]  ;;  %s1009_s29 = sshll.u32 %s1941_s11, 4  ;;  %s1010_s29 = int_to_ptr.vmem [resolvable:$true] %s1009_s29 }
 0x4f0   : > { %s2095_s18 = sld [smem:[#allocation22_spill]]  ;;  %s992_s10 = scalar_lea.sflag [#allocation4], %s1782_s15 }
 0x4f5   : > { %s1217_s19 = sshll.u32 %s2093_s0, 4 }
 0x4f6   : > { %s2096_s30 = smov %s2095_s18  ;;  %s1008_s4 = scalar_lea.hbm %s2095_s18, %s1217_s19 }
 0x4f7   : > { %s1011_s9 = sshll.u32 %s1008_s4, 4  ;;  %s1449_s7 = scalar_lea.hbm %s2096_s30, 32  ;;  %s1012_s9 = int_to_ptr.hbm [resolvable:$true] %s1011_s9 }
 0x4f8   : > { %s1443_s23 = sshra.s32 %s1012_s9, 4  ;;  %s1444_s23 = int_to_ptr.hbm [resolvable:$true] %s1443_s23 }
 0x4f9   : > { %s1445_s24 = scalar_lea.hbm %s1444_s23, 16  ;;  %p1450_p4 = scmp.lt.s32.totalorder %s1444_s23, %s2096_s30 }
 0x4fa   : > { %p1446_p10 = scmp.ne.s32.totalorder %s1444_s23, %s1445_s24  ;;  %p1451_p5 = scmp.lt.s32.totalorder %s1449_s7, %s1445_s24 }
 0x4fc   : > { %p1447_p0 = pnand %p1446_p10, %p1703_p8  ;;  %p1452_p7 = por %p1451_p5, %p1450_p4 }
 0x4fe   : > { %p1448_p2 = pneg %p1447_p0 }
 0x500   : > { %p1453_p11 = pnand %p1452_p7, %p1448_p2 }
 0x502   : > { %1456 = shalt.err (!%p1453_p11)
}
 0x503   : > { %s1599_s11 = smov 128   ;;  %s1600_s19 = smov 8  }
 0x504   : > { %1229 = dma.vmem_to_hbm [thread:$0]  (%p1703_p8), %s1010_s29, 256, %s1012_s9, %s992_s10, %s1599_s11, %s1599_s11, %s1600_s19  }
 0x505   : > { %s1218_s26 = sshll.u32 %s2093_s0, 2  ;;  %s1026_s3 = sshll.u32 %s1948_s12, 4  ;;  %s1027_s3 = int_to_ptr.vmem [resolvable:$true] %s1026_s3 }
 0x506   : > { %s2097_s6 = sld [smem:[#allocation23_spill]]  ;;  %s997_s24 = scalar_lea.sflag [#allocation9], %s1782_s15 }
 0x50c   : > { %s1025_s1 = scalar_lea.hbm %s2097_s6, %s1218_s26  ;;  %s1477_s0 = scalar_lea.hbm %s2097_s6, 8 }
 0x50d   : > { %s1028_s23 = sshll.u32 %s1025_s1, 4  ;;  %s1029_s23 = int_to_ptr.hbm [resolvable:$true] %s1028_s23 }
 0x50e   : > { %s1471_s8 = sshra.s32 %s1029_s23, 4  ;;  %s1472_s8 = int_to_ptr.hbm [resolvable:$true] %s1471_s8 }
 0x50f   : > { %s1473_s7 = scalar_lea.hbm %s1472_s8, 4  ;;  %p1478_p3 = scmp.lt.s32.totalorder %s1472_s8, %s2097_s6 }
 0x510   : > { %p1474_p12 = scmp.ne.s32.totalorder %s1472_s8, %s1473_s7  ;;  %p1479_p6 = scmp.lt.s32.totalorder %s1477_s0, %s1473_s7 }
 0x512   : > { %p1475_p13 = pnand %p1474_p12, %p1703_p8  ;;  %p1480_p10 = por %p1479_p6, %p1478_p3 }
 0x514   : > { %p1476_p1 = pneg %p1475_p13 }
 0x516   : > { %p1481_p0 = pnand %p1480_p10, %p1476_p1 }
 0x518   : > { %1484 = shalt.err (!%p1481_p0)
}
 0x519   : > { %s1601_s15 = smov 32   ;;  %s1602_s9 = smov 2  }
 0x51a   : > { %1230 = dma.vmem_to_hbm [thread:$0]  (%p1703_p8), %s1027_s3, 64, %s1029_s23, %s997_s24, %s1601_s15, %s1601_s15, %s1602_s9  }
 0x51b PF: > { %s2098_s10 = sld [smem:[#allocation14_spill]]  ;;  %p1248_p2 = scmp.ge.s32.totalorder %s1587_s22, 2 }
 0x51d   : > { %p1241_p4 = pnand %p1248_p2, %p1707_p9 }
 0x51f   : > { %p1242_p5 = pneg %p1241_p4 }
 0x521   : > { %s1043_s30 = sand.u32 1, %s2098_s10  }
 0x522   : > { %s1044_s19 = scalar_lea.sflag [#allocation4], %s1043_s30 }
 0x523   : > { %1538 = dma.done.wait (%p1242_p5), %s1044_s19, 256  }
 0x524   : > { %1540 = vsyncadd (%p1242_p5), %s1044_s19, 4294967040  ;;  %s1054_s26 = scalar_lea.sflag [#allocation9], %s1043_s30 }
 0x525   : > { %1542 = dma.done.wait (%p1242_p5), %s1054_s26, 64  }
 0x526   : > { %1544 = vsyncadd (%p1242_p5), %s1054_s26, 4294967232  ;;  %s26_s22 = sadd.s32 1, %s1587_s22   ;;  %s2100_s2 = sld [smem:[#allocation19_spill]] }
 0x527   : > { %p23_p7 = scmp.ge.s32.totalorder %s26_s22, 6   ;;  %s2101_s12 = smov %s1551_s13 }
 0x528   : > { %s2102_s13 = smov %s1555_s14  ;;  %s2103_s14 = smov %s1768_s27 }
 0x529   : > { %s2104_s15 = smov %s1563_s16  ;;  %s2105_s16 = smov %s1567_s17 }
 0x52a   : > { %s2106_s17 = smov %s1765_s28  ;;  %s2107_s18 = smov %s1579_s20 }
 0x52b   : > { %s2108_s19 = smov %s1583_s21  ;;  %s2110_s21 = smov %s2116_s25 }
 0x52c   : > { %s2109_s20 = smov %s2100_s2  ;;  %25 = sbr.rel (!%p23_p7) target bundleno = 18 (0x12), region = 108 }
 0x531   :  { %1060 = vsyncpa [#allocation3], 1 }
 0x532   :  { %1062 = vsyncpa [#allocation3 + $0x1], 1 }
 0x533   :  { %1063 = vsyncpa [#allocation6], 1 }
 0x534   :  { %1065 = vsyncpa [#allocation6 + $0x1], 1 }
 0x535   :  { %1066 = vsyncpa [#allocation4], 1 }
 0x536   :  { %1068 = vsyncpa [#allocation4 + $0x1], 1 }
 0x537   :  { %1069 = vsyncpa [#allocation9], 1 }
 0x538   :  { %1071 = vsyncpa [#allocation9 + $0x1], 1 }

</bundles_post_ra>
